<compile_context>
chip_gen: v7x
topology: tpu7x:2x2x1
jax: 0.10.0
libtpu: 0.0.40
codegen_flags: <defaults>
</compile_context>

<pallas_src>
import jax
import jax.numpy as jnp
from jax.experimental import pallas as pl
from jax.experimental.pallas import tpu as pltpu

_NEG_SLOPE = 0.4
_LANE = 128


def _round_up(n, m):
    return ((n + m - 1) // m) * m


def encoder_kernel(x_ref, *refs):
    """Fused 5-layer MLP: (h @ W_i + b_i) -> LeakyReLU(0.4), all in VMEM.

    refs = (w1, b1, w2, b2, w3, b3, w4, b4, w5, b5, o_ref).
    Weights are [in_pad, out_pad] in the MXU operand dtype; biases are f32.
    """
    o_ref = refs[-1]
    wb = refs[:-1]

    h = x_ref[...]                      # MXU operand dtype (f32 or bf16)
    acc = None
    for li in range(5):
        w_ref = wb[2 * li]
        b_ref = wb[2 * li + 1]
        # MXU matmul with f32 accumulation.
        acc = jnp.dot(h, w_ref[...], preferred_element_type=jnp.float32)
        # Bias add + LeakyReLU in f32 (VPU), regardless of operand dtype.
        acc = acc + b_ref[...].astype(jnp.float32)
        acc = jnp.where(acc > 0, acc, _NEG_SLOPE * acc)
        if li < 4:
            h = acc.astype(w_ref.dtype)  # back to MXU operand dtype for next dot
    o_ref[...] = acc.astype(o_ref.dtype)


def encoder_forward(x, params, *, batch_tile=1024, compute_dtype=jnp.float32):
    """x: [B, input_size]; params: list of (W_t [in, out], b [1, out]) in f32.

    batch_tile: rows per grid step (sweep 512-4096; multiple of 128 recommended).
    compute_dtype: MXU operand dtype (use jnp.bfloat16 on v6e/v7x, f32 on v5e).
    """
    B, in_dim = x.shape
    out_dim = params[-1][0].shape[1]

    in_pad = _round_up(in_dim, _LANE)

    # ---- Lane-dense padding of weights / biases (zeros preserve the math). ----
    padded = []
    for (wt, b) in params:
        ki, ko = wt.shape
        ki_p, ko_p = _round_up(ki, _LANE), _round_up(ko, _LANE)
        w_p = jnp.pad(wt, ((0, ki_p - ki), (0, ko_p - ko))).astype(compute_dtype)
        b_p = jnp.pad(b, ((0, 0), (0, ko_p - b.shape[1]))).astype(jnp.float32)
        padded.append((w_p, b_p))
    out_pad = padded[-1][0].shape[1]

    # ---- Batch tiling: pad B to a tile multiple so any batch size works. ----
    tile = _round_up(min(batch_tile, _round_up(B, 8)), 8)
    B_pad = _round_up(B, tile)
    x_p = jnp.pad(x, ((0, B_pad - B), (0, in_pad - in_dim))).astype(compute_dtype)

    # Weight/bias specs: full (padded) arrays, constant block index -> stay
    # VMEM-resident across all grid steps (no per-step re-fetch).
    wb_specs = []
    for (w_p, b_p) in padded:
        wb_specs.append(pl.BlockSpec(w_p.shape, lambda i: (0, 0)))
        wb_specs.append(pl.BlockSpec(b_p.shape, lambda i: (0, 0)))

    grid = (B_pad // tile,)
    out = pl.pallas_call(
        encoder_kernel,
        out_shape=jax.ShapeDtypeStruct((B_pad, out_pad), x.dtype),
        grid_spec=pltpu.PrefetchScalarGridSpec(
            num_scalar_prefetch=0,
            grid=grid,
            in_specs=[pl.BlockSpec((tile, in_pad), lambda i: (i, 0))] + wb_specs,
            out_specs=pl.BlockSpec((tile, out_pad), lambda i: (i, 0)),
        ),
        compiler_params=pltpu.CompilerParams(
            dimension_semantics=("parallel",)),
    )(x_p, *[a for wb in padded for a in wb])

    # Slice away batch / lane padding.
    return out[:B, :out_dim]


def xavier_uniform(key, fan_out, fan_in, dtype=jnp.float32):
    # Matches torch.nn.init.xavier_uniform_ for a [out, in] Linear weight.
    bound = jnp.sqrt(6.0 / (fan_in + fan_out))
    return jax.random.uniform(key, (fan_out, fan_in), dtype=dtype,
                              minval=-bound, maxval=bound)


def make_params(key, input_size, hidden_size):
    dims = [input_size] + list(hidden_size)
    params = []
    for li in range(5):
        key, wk = jax.random.split(key)
        fan_in, fan_out = dims[li], dims[li + 1]
        w = xavier_uniform(wk, fan_out, fan_in)          # [out, in], torch layout
        b = jnp.zeros((1, fan_out), dtype=jnp.float32)   # constant 0.0 bias
        params.append((w.T, b))                          # store transposed [in, out]
    return params


def encoder_reference(x, params):
    h = x
    for (wt, b) in params:
        h = jnp.dot(h, wt) + b
        h = jnp.where(h > 0, h, _NEG_SLOPE * h)
    return h


if __name__ == "__main__":
    key = jax.random.PRNGKey(0)
    key, xk, pk = jax.random.split(key, 3)

    batch = 8
    input_size = 32
    hidden_size = (64, 48, 32, 24, 16)

    x = jax.random.normal(xk, (batch, input_size), dtype=jnp.float32)
    params = make_params(pk, input_size, hidden_size)
    ref = encoder_reference(x, params)

    # 1) Small-shape f32 path (exact PyTorch-equivalent numerics).
    out = jax.block_until_ready(
        encoder_forward(x, params, batch_tile=1024, compute_dtype=jnp.float32))
    assert out.shape == (batch, hidden_size[-1])
    assert jnp.allclose(out, ref, atol=1e-5, rtol=1e-5), "f32 mismatch vs reference"

    # 2) Larger batch, multi-step parallel grid, bf16 MXU operands
    #    (v6e / v7x fast path), f32 accumulation + f32 elementwise.
    key, xk2 = jax.random.split(key)
    big_batch = 2048
    xb = jax.random.normal(xk2, (big_batch, input_size), dtype=jnp.float32)
    refb = encoder_reference(xb, params)
    outb = jax.block_until_ready(
        encoder_forward(xb, params, batch_tile=512, compute_dtype=jnp.bfloat16))
    assert outb.shape == (big_batch, hidden_size[-1])
    assert jnp.allclose(outb, refb, atol=5e-2, rtol=5e-2), "bf16 mismatch vs reference"

    print("KERNEL_OK")
</pallas_src>

<mosaic_0001>
module attributes {stable_mosaic.version = 11 : i64} {
  func.func @encoder_kernel(%arg0: i32, %arg1: memref<8x128xf32, #tpu.memory_space<vmem>>, %arg2: memref<128x128xf32, #tpu.memory_space<vmem>>, %arg3: memref<1x128xf32, #tpu.memory_space<vmem>>, %arg4: memref<128x128xf32, #tpu.memory_space<vmem>>, %arg5: memref<1x128xf32, #tpu.memory_space<vmem>>, %arg6: memref<128x128xf32, #tpu.memory_space<vmem>>, %arg7: memref<1x128xf32, #tpu.memory_space<vmem>>, %arg8: memref<128x128xf32, #tpu.memory_space<vmem>>, %arg9: memref<1x128xf32, #tpu.memory_space<vmem>>, %arg10: memref<128x128xf32, #tpu.memory_space<vmem>>, %arg11: memref<1x128xf32, #tpu.memory_space<vmem>>, %arg12: memref<8x128xf32, #tpu.memory_space<vmem>>) attributes {dimension_semantics = [#tpu.dimension_semantics<parallel>], iteration_bounds = array<i64: 1>, scalar_prefetch = 0 : i64, scratch_operands = 0 : i64, tpu.core_type = #tpu.core_type<tc>, window_params = [{transform_indices = @transform_0, window_bounds = array<i64: 8, 128>}, {pipeline_mode = #tpu.pipeline_mode<synchronous>, transform_indices = @transform_1, window_bounds = array<i64: 128, 128>}, {pipeline_mode = #tpu.pipeline_mode<synchronous>, transform_indices = @transform_2, window_bounds = array<i64: 1, 128>}, {pipeline_mode = #tpu.pipeline_mode<synchronous>, transform_indices = @transform_3, window_bounds = array<i64: 128, 128>}, {pipeline_mode = #tpu.pipeline_mode<synchronous>, transform_indices = @transform_4, window_bounds = array<i64: 1, 128>}, {pipeline_mode = #tpu.pipeline_mode<synchronous>, transform_indices = @transform_5, window_bounds = array<i64: 128, 128>}, {pipeline_mode = #tpu.pipeline_mode<synchronous>, transform_indices = @transform_6, window_bounds = array<i64: 1, 128>}, {pipeline_mode = #tpu.pipeline_mode<synchronous>, transform_indices = @transform_7, window_bounds = array<i64: 128, 128>}, {pipeline_mode = #tpu.pipeline_mode<synchronous>, transform_indices = @transform_8, window_bounds = array<i64: 1, 128>}, {pipeline_mode = #tpu.pipeline_mode<synchronous>, transform_indices = @transform_9, window_bounds = array<i64: 128, 128>}, {pipeline_mode = #tpu.pipeline_mode<synchronous>, transform_indices = @transform_10, window_bounds = array<i64: 1, 128>}, {transform_indices = @transform_11, window_bounds = array<i64: 8, 128>}]} {
    %c0 = arith.constant 0 : index
    %c0_0 = arith.constant 0 : index
    %0 = vector.load %arg1[%c0, %c0_0] : memref<8x128xf32, #tpu.memory_space<vmem>>, vector<8x128xf32>
    %c0_1 = arith.constant 0 : index
    %c0_2 = arith.constant 0 : index
    %1 = vector.load %arg2[%c0_1, %c0_2] : memref<128x128xf32, #tpu.memory_space<vmem>>, vector<128x128xf32>
    %cst = arith.constant dense<0.000000e+00> : vector<8x128xf32>
    %2 = tpu.matmul %0, %1, %cst {dimension_numbers = #tpu.dot_dimension_numbers<[1], [0], [0], [1], [0, 0, 1, 1], [], []>} : vector<8x128xf32>, vector<128x128xf32>, vector<8x128xf32> -> vector<8x128xf32>
    %c0_3 = arith.constant 0 : index
    %c0_4 = arith.constant 0 : index
    %3 = vector.load %arg3[%c0_3, %c0_4] : memref<1x128xf32, #tpu.memory_space<vmem>>, vector<1x128xf32>
    %4 = vector.broadcast %3 : vector<1x128xf32> to vector<8x128xf32>
    %5 = arith.addf %2, %4 : vector<8x128xf32>
    %cst_5 = arith.constant 0.000000e+00 : f32
    %6 = vector.broadcast %cst_5 : f32 to vector<8x128xf32>
    %7 = arith.cmpf ogt, %5, %6 : vector<8x128xf32>
    %cst_6 = arith.constant 4.000000e-01 : f32
    %8 = vector.broadcast %cst_6 : f32 to vector<8x128xf32>
    %9 = arith.mulf %8, %5 : vector<8x128xf32>
    %10 = arith.select %7, %5, %9 : vector<8x128xi1>, vector<8x128xf32>
    %c0_7 = arith.constant 0 : index
    %c0_8 = arith.constant 0 : index
    %11 = vector.load %arg4[%c0_7, %c0_8] : memref<128x128xf32, #tpu.memory_space<vmem>>, vector<128x128xf32>
    %cst_9 = arith.constant dense<0.000000e+00> : vector<8x128xf32>
    %12 = tpu.matmul %10, %11, %cst_9 {dimension_numbers = #tpu.dot_dimension_numbers<[1], [0], [0], [1], [0, 0, 1, 1], [], []>} : vector<8x128xf32>, vector<128x128xf32>, vector<8x128xf32> -> vector<8x128xf32>
    %c0_10 = arith.constant 0 : index
    %c0_11 = arith.constant 0 : index
    %13 = vector.load %arg5[%c0_10, %c0_11] : memref<1x128xf32, #tpu.memory_space<vmem>>, vector<1x128xf32>
    %14 = vector.broadcast %13 : vector<1x128xf32> to vector<8x128xf32>
    %15 = arith.addf %12, %14 : vector<8x128xf32>
    %cst_12 = arith.constant 0.000000e+00 : f32
    %16 = vector.broadcast %cst_12 : f32 to vector<8x128xf32>
    %17 = arith.cmpf ogt, %15, %16 : vector<8x128xf32>
    %cst_13 = arith.constant 4.000000e-01 : f32
    %18 = vector.broadcast %cst_13 : f32 to vector<8x128xf32>
    %19 = arith.mulf %18, %15 : vector<8x128xf32>
    %20 = arith.select %17, %15, %19 : vector<8x128xi1>, vector<8x128xf32>
    %c0_14 = arith.constant 0 : index
    %c0_15 = arith.constant 0 : index
    %21 = vector.load %arg6[%c0_14, %c0_15] : memref<128x128xf32, #tpu.memory_space<vmem>>, vector<128x128xf32>
    %cst_16 = arith.constant dense<0.000000e+00> : vector<8x128xf32>
    %22 = tpu.matmul %20, %21, %cst_16 {dimension_numbers = #tpu.dot_dimension_numbers<[1], [0], [0], [1], [0, 0, 1, 1], [], []>} : vector<8x128xf32>, vector<128x128xf32>, vector<8x128xf32> -> vector<8x128xf32>
    %c0_17 = arith.constant 0 : index
    %c0_18 = arith.constant 0 : index
    %23 = vector.load %arg7[%c0_17, %c0_18] : memref<1x128xf32, #tpu.memory_space<vmem>>, vector<1x128xf32>
    %24 = vector.broadcast %23 : vector<1x128xf32> to vector<8x128xf32>
    %25 = arith.addf %22, %24 : vector<8x128xf32>
    %cst_19 = arith.constant 0.000000e+00 : f32
    %26 = vector.broadcast %cst_19 : f32 to vector<8x128xf32>
    %27 = arith.cmpf ogt, %25, %26 : vector<8x128xf32>
    %cst_20 = arith.constant 4.000000e-01 : f32
    %28 = vector.broadcast %cst_20 : f32 to vector<8x128xf32>
    %29 = arith.mulf %28, %25 : vector<8x128xf32>
    %30 = arith.select %27, %25, %29 : vector<8x128xi1>, vector<8x128xf32>
    %c0_21 = arith.constant 0 : index
    %c0_22 = arith.constant 0 : index
    %31 = vector.load %arg8[%c0_21, %c0_22] : memref<128x128xf32, #tpu.memory_space<vmem>>, vector<128x128xf32>
    %cst_23 = arith.constant dense<0.000000e+00> : vector<8x128xf32>
    %32 = tpu.matmul %30, %31, %cst_23 {dimension_numbers = #tpu.dot_dimension_numbers<[1], [0], [0], [1], [0, 0, 1, 1], [], []>} : vector<8x128xf32>, vector<128x128xf32>, vector<8x128xf32> -> vector<8x128xf32>
    %c0_24 = arith.constant 0 : index
    %c0_25 = arith.constant 0 : index
    %33 = vector.load %arg9[%c0_24, %c0_25] : memref<1x128xf32, #tpu.memory_space<vmem>>, vector<1x128xf32>
    %34 = vector.broadcast %33 : vector<1x128xf32> to vector<8x128xf32>
    %35 = arith.addf %32, %34 : vector<8x128xf32>
    %cst_26 = arith.constant 0.000000e+00 : f32
    %36 = vector.broadcast %cst_26 : f32 to vector<8x128xf32>
    %37 = arith.cmpf ogt, %35, %36 : vector<8x128xf32>
    %cst_27 = arith.constant 4.000000e-01 : f32
    %38 = vector.broadcast %cst_27 : f32 to vector<8x128xf32>
    %39 = arith.mulf %38, %35 : vector<8x128xf32>
    %40 = arith.select %37, %35, %39 : vector<8x128xi1>, vector<8x128xf32>
    %c0_28 = arith.constant 0 : index
    %c0_29 = arith.constant 0 : index
    %41 = vector.load %arg10[%c0_28, %c0_29] : memref<128x128xf32, #tpu.memory_space<vmem>>, vector<128x128xf32>
    %cst_30 = arith.constant dense<0.000000e+00> : vector<8x128xf32>
    %42 = tpu.matmul %40, %41, %cst_30 {dimension_numbers = #tpu.dot_dimension_numbers<[1], [0], [0], [1], [0, 0, 1, 1], [], []>} : vector<8x128xf32>, vector<128x128xf32>, vector<8x128xf32> -> vector<8x128xf32>
    %c0_31 = arith.constant 0 : index
    %c0_32 = arith.constant 0 : index
    %43 = vector.load %arg11[%c0_31, %c0_32] : memref<1x128xf32, #tpu.memory_space<vmem>>, vector<1x128xf32>
    %44 = vector.broadcast %43 : vector<1x128xf32> to vector<8x128xf32>
    %45 = arith.addf %42, %44 : vector<8x128xf32>
    %cst_33 = arith.constant 0.000000e+00 : f32
    %46 = vector.broadcast %cst_33 : f32 to vector<8x128xf32>
    %47 = arith.cmpf ogt, %45, %46 : vector<8x128xf32>
    %cst_34 = arith.constant 4.000000e-01 : f32
    %48 = vector.broadcast %cst_34 : f32 to vector<8x128xf32>
    %49 = arith.mulf %48, %45 : vector<8x128xf32>
    %50 = arith.select %47, %45, %49 : vector<8x128xi1>, vector<8x128xf32>
    %c0_35 = arith.constant 0 : index
    %c0_36 = arith.constant 0 : index
    %51 = vector.load %arg12[%c0_35, %c0_36] : memref<8x128xf32, #tpu.memory_space<vmem>>, vector<8x128xf32>
    tpu.vector_store %arg12[%c0_35, %c0_36], %50 {strides = array<i32>} : memref<8x128xf32, #tpu.memory_space<vmem>>, vector<8x128xf32>,
    return
  }
  func.func @transform_0(%arg0: i32) -> (i32, i32) {
    %c0_i32 = arith.constant 0 : i32
    %c0_i32_0 = arith.constant 0 : i32
    return %arg0, %c0_i32 : i32, i32
  }
  func.func @transform_1(%arg0: i32) -> (i32, i32) {
    %c0_i32 = arith.constant 0 : i32
    %c0_i32_0 = arith.constant 0 : i32
    %c0_i32_1 = arith.constant 0 : i32
    return %c0_i32, %c0_i32_0 : i32, i32
  }
  func.func @transform_2(%arg0: i32) -> (i32, i32) {
    %c0_i32 = arith.constant 0 : i32
    %c0_i32_0 = arith.constant 0 : i32
    %c0_i32_1 = arith.constant 0 : i32
    return %c0_i32, %c0_i32_0 : i32, i32
  }
  func.func @transform_3(%arg0: i32) -> (i32, i32) {
    %c0_i32 = arith.constant 0 : i32
    %c0_i32_0 = arith.constant 0 : i32
    %c0_i32_1 = arith.constant 0 : i32
    return %c0_i32, %c0_i32_0 : i32, i32
  }
  func.func @transform_4(%arg0: i32) -> (i32, i32) {
    %c0_i32 = arith.constant 0 : i32
    %c0_i32_0 = arith.constant 0 : i32
    %c0_i32_1 = arith.constant 0 : i32
    return %c0_i32, %c0_i32_0 : i32, i32
  }
  func.func @transform_5(%arg0: i32) -> (i32, i32) {
    %c0_i32 = arith.constant 0 : i32
    %c0_i32_0 = arith.constant 0 : i32
    %c0_i32_1 = arith.constant 0 : i32
    return %c0_i32, %c0_i32_0 : i32, i32
  }
  func.func @transform_6(%arg0: i32) -> (i32, i32) {
    %c0_i32 = arith.constant 0 : i32
    %c0_i32_0 = arith.constant 0 : i32
    %c0_i32_1 = arith.constant 0 : i32
    return %c0_i32, %c0_i32_0 : i32, i32
  }
  func.func @transform_7(%arg0: i32) -> (i32, i32) {
    %c0_i32 = arith.constant 0 : i32
    %c0_i32_0 = arith.constant 0 : i32
    %c0_i32_1 = arith.constant 0 : i32
    return %c0_i32, %c0_i32_0 : i32, i32
  }
  func.func @transform_8(%arg0: i32) -> (i32, i32) {
    %c0_i32 = arith.constant 0 : i32
    %c0_i32_0 = arith.constant 0 : i32
    %c0_i32_1 = arith.constant 0 : i32
    return %c0_i32, %c0_i32_0 : i32, i32
  }
  func.func @transform_9(%arg0: i32) -> (i32, i32) {
    %c0_i32 = arith.constant 0 : i32
    %c0_i32_0 = arith.constant 0 : i32
    %c0_i32_1 = arith.constant 0 : i32
    return %c0_i32, %c0_i32_0 : i32, i32
  }
  func.func @transform_10(%arg0: i32) -> (i32, i32) {
    %c0_i32 = arith.constant 0 : i32
    %c0_i32_0 = arith.constant 0 : i32
    %c0_i32_1 = arith.constant 0 : i32
    return %c0_i32, %c0_i32_0 : i32, i32
  }
  func.func @transform_11(%arg0: i32) -> (i32, i32) {
    %c0_i32 = arith.constant 0 : i32
    %c0_i32_0 = arith.constant 0 : i32
    return %arg0, %c0_i32 : i32, i32
  }
}

</mosaic_0001>

<bundles_post_ra>
// kernel: tpu_custom_call.1
= control target key start
LH: loop header
LB: loop body
LE: loop exit
PB: predicated region body
PF: predicated region fallthrough
CT: control target
= control target key end

     0   :  { %16 = vsyncpa [#allocation3], 0  ;;  %s1416_s0 = inlined_call_operand.hbm [shape: f32[8,128], index: 0, kind: input, shape index: {}]   ;;  %s1417_s1 = inlined_call_operand.hbm [shape: f32[128,128], index: 1, kind: input, shape index: {}]   ;;  %s1418_s2 = inlined_call_operand.vmem [shape: f32[1,128], index: 2, kind: input, shape index: {}]   ;;  %s1419_s3 = inlined_call_operand.hbm [shape: f32[128,128], index: 3, kind: input, shape index: {}]   ;;  %s1420_s4 = inlined_call_operand.vmem [shape: f32[1,128], index: 4, kind: input, shape index: {}]   ;;  %s1421_s5 = inlined_call_operand.hbm [shape: f32[128,128], index: 5, kind: input, shape index: {}]   ;;  %s1422_s6 = inlined_call_operand.vmem [shape: f32[1,128], index: 6, kind: input, shape index: {}]   ;;  %s1423_s7 = inlined_call_operand.hbm [shape: f32[128,128], index: 7, kind: input, shape index: {}]   ;;  %s1424_s8 = inlined_call_operand.vmem [shape: f32[1,128], index: 8, kind: input, shape index: {}]   ;;  %s1425_s9 = inlined_call_operand.hbm [shape: f32[128,128], index: 9, kind: input, shape index: {}]   ;;  %s1426_s10 = inlined_call_operand.vmem [shape: f32[1,128], index: 10, kind: input, shape index: {}]   ;;  %s1427_s11 = inlined_call_operand.hbm [shape: f32[8,128], index: 11, kind: output, shape index: {}]  }
   0x1   :  { %17 = vsyncpa [#allocation6], 0 }
   0x2   :  { %18 = vsyncpa [#allocation9], 0 }
   0x3   :  { %19 = vsyncpa [#allocation12], 0 }
   0x4   :  { %20 = vsyncpa [#allocation4], 0  ;;  %s1180_s17 = smov [#allocation5]   ;;  %s1016_s21 = scalar_lea.hbm %s1417_s1, 2048 }
   0x5   :  { %s36_s18 = sshll.u32 %s1180_s17, 4  ;;  %p1017_p0 = scmp.ne.s32.totalorder %s1417_s1, %s1016_s21  ;;  %s37_s18 = int_to_ptr.vmem [resolvable:$true] %s36_s18 }
   0x6   :  { %p1020_p1 = scmp.lt.u32.totalorder %s1016_s21, %s1417_s1 }
   0x8   :  { %p1022_p2 = pnand %p1020_p1, %p1017_p0 }
   0xa   :  { %1025 = shalt.err (!%p1022_p2)
}
   0xb   :  { %s1026_s26 = scalar_lea.vmem %s37_s18, 2048  ;;  %p1031_p4 = scmp.lt.s32.totalorder %s37_s18, %s37_s18 }
   0xc   :  { %p1027_p3 = scmp.ne.s32.totalorder %s37_s18, %s1026_s26  ;;  %p1032_p5 = scmp.lt.s32.totalorder %s1026_s26, %s1026_s26 }
   0xe   :  { %p1033_p6 = por %p1032_p5, %p1031_p4 }
  0x10   :  { %p1034_p7 = pnand %p1033_p6, %p1027_p3 }
  0x12   :  { %1037 = shalt.err (!%p1034_p7)
}
  0x13   :  { %s1181_s27 = smov 128   ;;  %s1182_s28 = smov 8  }
  0x14   :  { %42 = dma.hbm_to_vmem [thread:$0]  %s1417_s1, 2048, %s37_s18, [#allocation6], %s1181_s27, %s1181_s27, %s1182_s28  }
  0x15   :  { %s1183_s12 = smov [#allocation8]   ;;  %s1184_s14 = smov [#allocation2]  }
  0x16   :  { %s64_s13 = sshll.u32 %s1183_s12, 4  ;;  %s27_s15 = sshll.u32 %s1184_s14, 4  ;;  %s65_s13 = int_to_ptr.vmem [resolvable:$true] %s64_s13  ;;  %s28_s15 = int_to_ptr.vmem [resolvable:$true] %s27_s15 }
  0x17   :  { %s1038_s19 = scalar_lea.hbm %s1421_s5, 2048 }
  0x18   :  { %p1039_p8 = scmp.ne.s32.totalorder %s1421_s5, %s1038_s19  ;;  %p1042_p9 = scmp.lt.u32.totalorder %s1038_s19, %s1421_s5 }
  0x1a   :  { %p1044_p10 = pnand %p1042_p9, %p1039_p8 }
  0x1c   :  { %1047 = shalt.err (!%p1044_p10)
}
  0x1d   :  { %s1048_s1 = scalar_lea.vmem %s65_s13, 2048  ;;  %p1053_p12 = scmp.lt.s32.totalorder %s65_s13, %s65_s13 }
  0x1e   :  { %p1049_p11 = scmp.ne.s32.totalorder %s65_s13, %s1048_s1  ;;  %p1054_p13 = scmp.lt.s32.totalorder %s1048_s1, %s1048_s1 }
  0x20   :  { %p1055_p0 = por %p1054_p13, %p1053_p12 }
  0x22   :  { %p1056_p1 = pnand %p1055_p0, %p1049_p11 }
  0x24   :  { %1059 = shalt.err (!%p1056_p1)
}
  0x25   :  { %70 = dma.hbm_to_vmem [thread:$0]  %s1421_s5, 2048, %s65_s13, [#allocation9], %s1181_s27, %s1181_s27, %s1182_s28  }
  0x26   :  { %s1060_s29 = scalar_lea.hbm %s1416_s0, 128 }
  0x27   :  { %p1061_p2 = scmp.ne.s32.totalorder %s1416_s0, %s1060_s29  ;;  %p1064_p3 = scmp.lt.u32.totalorder %s1060_s29, %s1416_s0 }
  0x29   :  { %p1066_p4 = pnand %p1064_p3, %p1061_p2 }
  0x2b   :  { %1069 = shalt.err (!%p1066_p4)
}
  0x2c   :  { %s1070_s17 = scalar_lea.vmem %s28_s15, 128  ;;  %p1075_p6 = scmp.lt.s32.totalorder %s28_s15, %s28_s15 }
  0x2d   :  { %p1071_p5 = scmp.ne.s32.totalorder %s28_s15, %s1070_s17  ;;  %p1076_p7 = scmp.lt.s32.totalorder %s1070_s17, %s1070_s17 }
  0x2f   :  { %p1077_p8 = por %p1076_p7, %p1075_p6 }
  0x31   :  { %p1078_p9 = pnand %p1077_p8, %p1071_p5 }
  0x33   :  { %1081 = shalt.err (!%p1078_p9)
}
  0x34   :  { %30 = dma.hbm_to_vmem [thread:$0]  %s1416_s0, 128, %s28_s15, [#allocation3]  }
  0x35   :  { %s1185_s19 = smov [#allocation7]   ;;  %s1186_s21 = smov [#allocation10]  }
  0x36   :  { %s50_s20 = sshll.u32 %s1185_s19, 4  ;;  %s78_s22 = sshll.u32 %s1186_s21, 4  ;;  %s51_s20 = int_to_ptr.vmem [resolvable:$true] %s50_s20  ;;  %s79_s22 = int_to_ptr.vmem [resolvable:$true] %s78_s22 }
  0x37   :  { %s1082_s18 = scalar_lea.hbm %s1419_s3, 2048 }
  0x38   :  { %p1083_p10 = scmp.ne.s32.totalorder %s1419_s3, %s1082_s18  ;;  %p1086_p11 = scmp.lt.u32.totalorder %s1082_s18, %s1419_s3 }
  0x3a   :  { %p1088_p12 = pnand %p1086_p11, %p1083_p10 }
  0x3c   :  { %1091 = shalt.err (!%p1088_p12)
}
  0x3d   :  { %s1092_s0 = scalar_lea.vmem %s51_s20, 2048  ;;  %p1097_p0 = scmp.lt.s32.totalorder %s51_s20, %s51_s20 }
  0x3e   :  { %p1093_p13 = scmp.ne.s32.totalorder %s51_s20, %s1092_s0  ;;  %p1098_p1 = scmp.lt.s32.totalorder %s1092_s0, %s1092_s0 }
  0x40   :  { %p1099_p2 = por %p1098_p1, %p1097_p0 }
  0x42   :  { %p1100_p3 = pnand %p1099_p2, %p1093_p13 }
  0x44   :  { %1103 = shalt.err (!%p1100_p3)
}
  0x45   :  { %56 = dma.hbm_to_vmem [thread:$0]  %s1419_s3, 2048, %s51_s20, [#allocation6], %s1181_s27, %s1181_s27, %s1182_s28  }
  0x46   :  { %s1104_s16 = scalar_lea.hbm %s1423_s7, 2048 }
  0x47   :  { %p1105_p4 = scmp.ne.s32.totalorder %s1423_s7, %s1104_s16  ;;  %p1108_p5 = scmp.lt.u32.totalorder %s1104_s16, %s1423_s7 }
  0x49   :  { %p1110_p6 = pnand %p1108_p5, %p1105_p4 }
  0x4b   :  { %1113 = shalt.err (!%p1110_p6)
}
  0x4c   :  { %s1114_s21 = scalar_lea.vmem %s79_s22, 2048  ;;  %p1119_p8 = scmp.lt.s32.totalorder %s79_s22, %s79_s22 }
  0x4d   :  { %p1115_p7 = scmp.ne.s32.totalorder %s79_s22, %s1114_s21  ;;  %p1120_p9 = scmp.lt.s32.totalorder %s1114_s21, %s1114_s21 }
  0x4f   :  { %p1121_p10 = por %p1120_p9, %p1119_p8 }
  0x51   :  { %p1122_p11 = pnand %p1121_p10, %p1115_p7 }
  0x53   :  { %1125 = shalt.err (!%p1122_p11)
}
  0x54   :  { %84 = dma.hbm_to_vmem [thread:$0]  %s1423_s7, 2048, %s79_s22, [#allocation9], %s1181_s27, %s1181_s27, %s1182_s28  }
  0x55   :  { %s1187_s23 = smov [#allocation11]   ;;  %s1126_s25 = scalar_lea.hbm %s1425_s9, 2048 }
  0x56   :  { %s92_s1 = sshll.u32 %s1187_s23, 4  ;;  %p1127_p12 = scmp.ne.s32.totalorder %s1425_s9, %s1126_s25  ;;  %s93_s1 = int_to_ptr.vmem [resolvable:$true] %s92_s1 }
  0x57   :  { %p1130_p13 = scmp.lt.u32.totalorder %s1126_s25, %s1425_s9 }
  0x59   :  { %p1132_p0 = pnand %p1130_p13, %p1127_p12 }
  0x5b   :  { %1135 = shalt.err (!%p1132_p0)
}
  0x5c   :  { %s1136_s30 = scalar_lea.vmem %s93_s1, 2048  ;;  %p1141_p2 = scmp.lt.s32.totalorder %s93_s1, %s93_s1 }
  0x5d   :  { %p1137_p1 = scmp.ne.s32.totalorder %s93_s1, %s1136_s30  ;;  %p1142_p3 = scmp.lt.s32.totalorder %s1136_s30, %s1136_s30 }
  0x5f   :  { %p1143_p4 = por %p1142_p3, %p1141_p2 }
  0x61   :  { %p1144_p5 = pnand %p1143_p4, %p1137_p1 }
  0x63   :  { %1147 = shalt.err (!%p1144_p5)
}
  0x64   :  { %98 = dma.hbm_to_vmem [thread:$0]  %s1425_s9, 2048, %s93_s1, [#allocation12], %s1181_s27, %s1181_s27, %s1182_s28  }
  0x65   :  { %1170 = dma.done.wait [#allocation3], 128  }
  0x66   :  { %1171 = vsyncadd [#allocation3], 4294967168 }
  0x67   :  { %1172 = dma.done.wait [#allocation6], 4096  }
  0x68   :  { %1173 = vsyncadd [#allocation6], 4294963200 }
  0x69   :  { %1174 = dma.done.wait [#allocation9], 4096  }
  0x6a   :  { %1175 = vsyncadd [#allocation9], 4294963200 }
  0x6b   :  { %1176 = dma.done.wait [#allocation12], 2048  }
  0x6c   :  { %1177 = vsyncadd [#allocation12], 4294965248  ;;  %v1188_v0 = vmov 0.0|0.0   ;;  %vm1189_vm0 = vmmov 0   ;;  %v1190_v1 = vmov 0.0   ;;  %v120_v2 = vld [vmem:[#allocation5] sm:$0xff] }
  0x6d   :  { %884 = vmatprep.subr.bf16.mxu0 %v1188_v0  ;;  %741 = vmatprep.mubr.msk.f32.mxu0 %vm1189_vm0, %v1190_v1  ;;  %v121_v3 = vld [vmem:[#allocation5 + $0x8] sm:$0xff]  ;;  %v122_v4 = vld [vmem:[#allocation5 + $0x10] sm:$0xff]  ;;  %v123_v6 = vld [vmem:[#allocation5 + $0x18] sm:$0xff]  ;;  %s1191_s5 = smov [#allocation13]  }
  0x6e   :  { %908 = vmatprep.subr.bf16.mxu1 %v1188_v0  ;;  %776 = vmatprep.mubr.msk.f32.mxu1 %vm1189_vm0, %v1190_v1  ;;  %v885_v5 = vpack.c.bf16 %v121_v3, %v120_v2  ;;  %v888_v7 = vpack.c.bf16 %v123_v6, %v122_v4  ;;  %v124_v8 = vld [vmem:[#allocation5 + $0x20] sm:$0xff]  ;;  %v125_v9 = vld [vmem:[#allocation5 + $0x28] sm:$0xff]  ;;  %v218_v12 = vld [vmem:[#allocation7 + $0x10] sm:$0xff]  ;;  %s607_s13 = sshll.u32 %s1191_s5, 4  ;;  %s608_s13 = int_to_ptr.vmem [resolvable:$true] %s607_s13 }
  0x6f   :  { %v216_v10 = vld [vmem:[#allocation7] sm:$0xff]  ;;  %v217_v11 = vld [vmem:[#allocation7 + $0x8] sm:$0xff]  ;;  %v219_v13 = vld [vmem:[#allocation7 + $0x18] sm:$0xff]  ;;  %v891_v14 = vpack.c.bf16 %v125_v9, %v124_v8  ;;  %p1153_p7 = scmp.lt.s32.totalorder %s608_s13, %s608_s13 }
  0x70   :  { %886 = vmatpush3.bf16.msra.mxu0 %v885_v5  ;;  %v909_v15 = vpack.c.bf16 %v217_v11, %v216_v10  ;;  %v126_v16 = vld [vmem:[#allocation5 + $0x30] sm:$0xff]  ;;  %v127_v17 = vld [vmem:[#allocation5 + $0x38] sm:$0xff]  ;;  %v912_v18 = vpack.c.bf16 %v219_v13, %v218_v12  ;;  %v220_v19 = vld [vmem:[#allocation7 + $0x20] sm:$0xff] }
  0x71   :  { %887 = vmatprep.subr.bf16.mxu0 %v1188_v0  ;;  %v221_v20 = vld [vmem:[#allocation7 + $0x28] sm:$0xff]  ;;  %v894_v21 = vpack.c.bf16 %v127_v17, %v126_v16  ;;  %v128_v22 = vld [vmem:[#allocation5 + $0x40] sm:$0xff]  ;;  %v222_v25 = vld [vmem:[#allocation7 + $0x30] sm:$0xff] }
  0x72   :  { %910 = vmatpush3.bf16.msra.mxu1 %v909_v15  ;;  %v129_v23 = vld [vmem:[#allocation5 + $0x48] sm:$0xff]  ;;  %v915_v24 = vpack.c.bf16 %v221_v20, %v220_v19  ;;  %v223_v26 = vld [vmem:[#allocation7 + $0x38] sm:$0xff]  ;;  %v130_v28 = vld [vmem:[#allocation5 + $0x50] sm:$0xff] }
  0x73   :  { %911 = vmatprep.subr.bf16.mxu1 %v1188_v0  ;;  %v897_v27 = vpack.c.bf16 %v129_v23, %v128_v22  ;;  %v131_v29 = vld [vmem:[#allocation5 + $0x58] sm:$0xff]  ;;  %v918_v30 = vpack.c.bf16 %v223_v26, %v222_v25  ;;  %v224_v31 = vld [vmem:[#allocation7 + $0x40] sm:$0xff]  ;;  %v225_v32 = vld [vmem:[#allocation7 + $0x48] sm:$0xff] }
  0x74   :  { %889 = vmatpush3.bf16.msra.mxu0 %v888_v7  ;;  %v900_v33 = vpack.c.bf16 %v131_v29, %v130_v28  ;;  %v132_v34 = vld [vmem:[#allocation5 + $0x60] sm:$0xff]  ;;  %v133_v35 = vld [vmem:[#allocation5 + $0x68] sm:$0xff]  ;;  %v921_v36 = vpack.c.bf16 %v225_v32, %v224_v31  ;;  %v226_v37 = vld [vmem:[#allocation7 + $0x50] sm:$0xff] }
  0x75   :  { %890 = vmatprep.subr.bf16.mxu0 %v1188_v0  ;;  %v227_v38 = vld [vmem:[#allocation7 + $0x58] sm:$0xff]  ;;  %v903_v39 = vpack.c.bf16 %v133_v35, %v132_v34  ;;  %v134_v40 = vld [vmem:[#allocation5 + $0x70] sm:$0xff]  ;;  %v228_v43 = vld [vmem:[#allocation7 + $0x60] sm:$0xff] }
  0x76   :  { %913 = vmatpush3.bf16.msra.mxu1 %v912_v18  ;;  %v135_v41 = vld [vmem:[#allocation5 + $0x78] sm:$0xff]  ;;  %v924_v42 = vpack.c.bf16 %v227_v38, %v226_v37  ;;  %v229_v44 = vld [vmem:[#allocation7 + $0x68] sm:$0xff]  ;;  %v230_v48 = vld [vmem:[#allocation7 + $0x70] sm:$0xff] }
  0x77   :  { %914 = vmatprep.subr.bf16.mxu1 %v1188_v0  ;;  %v906_v45 = vpack.c.bf16 %v135_v41, %v134_v40  ;;  %v927_v46 = vpack.c.bf16 %v229_v44, %v228_v43  ;;  %v119_v47 = vld [vmem:[#allocation2] sm:$0xff]  ;;  %v312_v51 = vld [vmem:[#allocation8] sm:$0xff]  ;;  %v313_v52 = vld [vmem:[#allocation8 + $0x8] sm:$0xff] }
  0x78   :  { %892 = vmatpush3.bf16.msra.mxu0 %v891_v14  ;;  %v231_v49 = vld [vmem:[#allocation7 + $0x78] sm:$0xff]  ;;  %v314_v53 = vld [vmem:[#allocation8 + $0x10] sm:$0xff]  ;;  %v933_v54 = vpack.c.bf16 %v313_v52, %v312_v51  ;;  %v316_v57 = vld [vmem:[#allocation8 + $0x20] sm:$0xff] }
  0x79   :  { %893 = vmatprep.subr.bf16.mxu0 %v1188_v0  ;;  %v930_v50 = vpack.c.bf16 %v231_v49, %v230_v48  ;;  %v315_v55 = vld [vmem:[#allocation8 + $0x18] sm:$0xff]  ;;  %v317_v58 = vld [vmem:[#allocation8 + $0x28] sm:$0xff]  ;;  %v318_v60 = vld [vmem:[#allocation8 + $0x30] sm:$0xff] }
  0x7a   :  { %916 = vmatpush3.bf16.msra.mxu1 %v915_v24  ;;  %v936_v56 = vpack.c.bf16 %v315_v55, %v314_v53  ;;  %v939_v59 = vpack.c.bf16 %v317_v58, %v316_v57  ;;  %v319_v61 = vld [vmem:[#allocation8 + $0x38] sm:$0xff]  ;;  %v320_v63 = vld [vmem:[#allocation8 + $0x40] sm:$0xff]  ;;  %v321_v2 = vld [vmem:[#allocation8 + $0x48] sm:$0xff] }
  0x7b   :  { %917 = vmatprep.subr.bf16.mxu1 %v1188_v0  ;;  %v942_v62 = vpack.c.bf16 %v319_v61, %v318_v60  ;;  %v945_v3 = vpack.c.bf16 %v321_v2, %v320_v63  ;;  %v322_v4 = vld [vmem:[#allocation8 + $0x50] sm:$0xff]  ;;  %v323_v5 = vld [vmem:[#allocation8 + $0x58] sm:$0xff]  ;;  %v324_v7 = vld [vmem:[#allocation8 + $0x60] sm:$0xff] }
  0x7c   :  { %895 = vmatpush3.bf16.msra.mxu0 %v894_v21  ;;  %v948_v6 = vpack.c.bf16 %v323_v5, %v322_v4  ;;  %v325_v8 = vld [vmem:[#allocation8 + $0x68] sm:$0xff]  ;;  %v619_v10 = vld [vmem:[%s1418_s2] ss:$0 sm:$0xff]  ;;  %v326_v16 = vld [vmem:[#allocation8 + $0x70] sm:$0xff] }
  0x7d   :  { %896 = vmatprep.subr.bf16.mxu0 %v1188_v0  ;;  %v951_v9 = vpack.c.bf16 %v325_v8, %v324_v7  ;;  %v327_v17 = vld [vmem:[#allocation8 + $0x78] sm:$0xff]  ;;  %v408_v19 = vld [vmem:[#allocation10] sm:$0xff]  ;;  %v409_v20 = vld [vmem:[#allocation10 + $0x8] sm:$0xff] }
  0x7e   :  { %919 = vmatpush3.bf16.msra.mxu1 %v918_v30  ;;  %v954_v18 = vpack.c.bf16 %v327_v17, %v326_v16  ;;  %v410_v21 = vld [vmem:[#allocation10 + $0x10] sm:$0xff]  ;;  %v957_v22 = vpack.c.bf16 %v409_v20, %v408_v19  ;;  %v411_v23 = vld [vmem:[#allocation10 + $0x18] sm:$0xff]  ;;  %v412_v25 = vld [vmem:[#allocation10 + $0x20] sm:$0xff] }
  0x7f   :  { %920 = vmatprep.subr.bf16.mxu1 %v1188_v0  ;;  %v960_v24 = vpack.c.bf16 %v411_v23, %v410_v21  ;;  %v413_v26 = vld [vmem:[#allocation10 + $0x28] sm:$0xff]  ;;  %v414_v28 = vld [vmem:[#allocation10 + $0x30] sm:$0xff]  ;;  %v415_v29 = vld [vmem:[#allocation10 + $0x38] sm:$0xff] }
  0x80   :  { %898 = vmatpush3.bf16.msra.mxu0 %v897_v27  ;;  %v963_v27 = vpack.c.bf16 %v413_v26, %v412_v25  ;;  %v966_v30 = vpack.c.bf16 %v415_v29, %v414_v28  ;;  %v416_v31 = vld [vmem:[#allocation10 + $0x40] sm:$0xff]  ;;  %v417_v32 = vld [vmem:[#allocation10 + $0x48] sm:$0xff]  ;;  %v418_v34 = vld [vmem:[#allocation10 + $0x50] sm:$0xff] }
  0x81   :  { %899 = vmatprep.subr.bf16.mxu0 %v1188_v0  ;;  %v419_v35 = vld [vmem:[#allocation10 + $0x58] sm:$0xff]  ;;  %v420_v37 = vld [vmem:[#allocation10 + $0x60] sm:$0xff]  ;;  %v421_v38 = vld [vmem:[#allocation10 + $0x68] sm:$0xff] }
  0x82   :  { %922 = vmatpush3.bf16.msra.mxu1 %v921_v36  ;;  %v972_v36 = vpack.c.bf16 %v419_v35, %v418_v34  ;;  %v620_v40 = vld [vmem:[%s1420_s4] ss:$0 sm:$0xff]  ;;  %v504_v49 = vld [vmem:[#allocation11] sm:$0xff]  ;;  %v506_v51 = vld [vmem:[#allocation11 + $0x10] sm:$0xff] }
  0x83   :  { %923 = vmatprep.subr.bf16.mxu1 %v1188_v0  ;;  %v507_v53 = vld [vmem:[#allocation11 + $0x18] sm:$0xff]  ;;  %v508_v55 = vld [vmem:[#allocation11 + $0x20] sm:$0xff]  ;;  %v513_v61 = vld [vmem:[#allocation11 + $0x48] sm:$0xff] }
  0x84   :  { %901 = vmatpush3.bf16.msra.mxu0 %v900_v33  ;;  %v969_v33 = vpack.c.bf16 %v417_v32, %v416_v31  ;;  %v511_v58 = vld [vmem:[#allocation11 + $0x38] sm:$0xff]  ;;  %v512_v60 = vld [vmem:[#allocation11 + $0x40] sm:$0xff]  ;;  %v514_v63 = vld [vmem:[#allocation11 + $0x50] sm:$0xff] }
  0x85   :  { %902 = vmatprep.subr.bf16.mxu0 %v1188_v0  ;;  %v515_v2 = vld [vmem:[#allocation11 + $0x58] sm:$0xff]  ;;  %v516_v4 = vld [vmem:[#allocation11 + $0x60] sm:$0xff]  ;;  %v517_v5 = vld [vmem:[#allocation11 + $0x68] sm:$0xff] }
  0x86   :  { %925 = vmatpush3.bf16.msra.mxu1 %v924_v42  ;;  %v621_v7 = vld [vmem:[%s1422_s6] ss:$0 sm:$0xff] }
  0x87   :  { %926 = vmatprep.subr.bf16.mxu1 %v1188_v0  ;;  %v622_v16 = vld [vmem:[%s1424_s8] ss:$0 sm:$0xff]  ;;  %s1148_s8 = scalar_lea.vmem %s608_s13, 128 }
  0x88   :  { %904 = vmatpush3.bf16.msra.mxu0 %v903_v39  ;;  %v975_v39 = vpack.c.bf16 %v421_v38, %v420_v37  ;;  %v623_v21 = vld [vmem:[%s1426_s10] ss:$0 sm:$0xff]  ;;  %p1149_p6 = scmp.ne.s32.totalorder %s608_s13, %s1148_s8  ;;  %p1154_p8 = scmp.lt.s32.totalorder %s1148_s8, %s1148_s8 }
  0x89   :  { %905 = vmatprep.subr.bf16.mxu0 %v1188_v0 }
  0x8a   :  { %928 = vmatpush3.bf16.msra.mxu1 %v927_v46  ;;  %v422_v46 = vld [vmem:[#allocation10 + $0x70] sm:$0xff]  ;;  %p1155_p9 = por %p1154_p8, %p1153_p7 }
  0x8b   :  { %929 = vmatprep.subr.bf16.mxu1 %v1188_v0 }
  0x8c   :  { %907 = vmatpush3.bf16.msra.mxu0 %v906_v45  ;;  %p1156_p10 = pnand %p1155_p9, %p1149_p6 }
  0x8d   :  { %932 = vmatprep.subr.bf16.mxu0 %v1188_v0 }
  0x8e   :  { %931 = vmatpush3.bf16.msra.mxu1 %v930_v50  ;;  %v505_v50 = vld [vmem:[#allocation11 + $0x8] sm:$0xff] }
  0x8f   :  { %742 = vmatmul.mubr.f32.vlgmr.msra.gmra.mrb[0].mxu0 %v119_v47  ;;  %956 = vmatprep.subr.bf16.mxu1 %v1188_v0  ;;  %v423_v47 = vld [vmem:[#allocation10 + $0x78] sm:$0xff]  ;;  %v981_v52 = vpack.c.bf16 %v505_v50, %v504_v49 }
  0x90   :  { %811 = vmatprep.mubr.msk.f32.mxu0 %vm1189_vm0, %v1190_v1  ;;  %934 = vmatpush3.bf16.msra.mxu0 %v933_v54  ;;  %v978_v48 = vpack.c.bf16 %v423_v47, %v422_v46  ;;  %v984_v54 = vpack.c.bf16 %v507_v53, %v506_v51 }
  0x91   :  { %935 = vmatprep.subr.bf16.mxu0 %v1188_v0 }
  0x94   :  { %937 = vmatpush3.bf16.msra.mxu0 %v936_v56  ;;  %v509_v56 = vld [vmem:[#allocation11 + $0x28] sm:$0xff] }
  0x95   :  { %938 = vmatprep.subr.bf16.mxu0 %v1188_v0  ;;  %v987_v57 = vpack.c.bf16 %v509_v56, %v508_v55 }
  0x98   :  { %940 = vmatpush3.bf16.msra.mxu0 %v939_v59 }
  0x99   :  { %941 = vmatprep.subr.bf16.mxu0 %v1188_v0 }
  0x9c   :  { %943 = vmatpush3.bf16.msra.mxu0 %v942_v62  ;;  %v993_v62 = vpack.c.bf16 %v513_v61, %v512_v60 }
  0x9d   :  { %944 = vmatprep.subr.bf16.mxu0 %v1188_v0 }
  0xa0   :  { %946 = vmatpush3.bf16.msra.mxu0 %v945_v3  ;;  %v996_v3 = vpack.c.bf16 %v515_v2, %v514_v63 }
  0xa1   :  { %947 = vmatprep.subr.bf16.mxu0 %v1188_v0 }
  0xa4   :  { %949 = vmatpush3.bf16.msra.mxu0 %v948_v6  ;;  %v999_v6 = vpack.c.bf16 %v517_v5, %v516_v4 }
  0xa5   :  { %950 = vmatprep.subr.bf16.mxu0 %v1188_v0 }
  0xa8   :  { %952 = vmatpush3.bf16.msra.mxu0 %v951_v9 }
  0xa9   :  { %953 = vmatprep.subr.bf16.mxu0 %v1188_v0 }
  0xac   :  { %955 = vmatpush3.bf16.msra.mxu0 %v954_v18 }
  0xad   :  { %980 = vmatprep.subr.bf16.mxu0 %v1188_v0 }
 0x162   :  { %v209_v11 = vpop.f32.mrb[0].mxu0 }
 0x163   :  { %v210_v12 = vadd.f32 %v619_v10, %v209_v11  ;;  %v743_v13 = vpop.f32.mrb[1].mxu0 }
 0x164   :  { %v518_v13 = vld [vmem:[#allocation11 + $0x70] sm:$0xff] }
 0x165   :  { %v214_v14 = vmul.f32 0.4, %v210_v12  ;;  %vm213_vm1 = vcmp.gt.f32.partialorder %v210_v12, 0.0 }
 0x167   :  { %v215_v15 = vsel %vm213_vm1, %v210_v12, %v214_v14  ;;  %v519_v14 = vld [vmem:[#allocation11 + $0x78] sm:$0xff] }
 0x168   :  { %777 = vmatmul.mubr.f32.vlgmr.msra.gmra.mrb[0].mxu1 %v215_v15  ;;  %v1002_v15 = vpack.c.bf16 %v519_v14, %v518_v13 }
 0x169   :  { %846 = vmatprep.mubr.msk.f32.mxu1 %vm1189_vm0, %v1190_v1  ;;  %958 = vmatpush3.bf16.msra.mxu1 %v957_v22 }
 0x16a   :  { %959 = vmatprep.subr.bf16.mxu1 %v1188_v0 }
 0x16d   :  { %961 = vmatpush3.bf16.msra.mxu1 %v960_v24 }
 0x16e   :  { %962 = vmatprep.subr.bf16.mxu1 %v1188_v0 }
 0x171   :  { %964 = vmatpush3.bf16.msra.mxu1 %v963_v27 }
 0x172   :  { %965 = vmatprep.subr.bf16.mxu1 %v1188_v0 }
 0x175   :  { %967 = vmatpush3.bf16.msra.mxu1 %v966_v30 }
 0x176   :  { %968 = vmatprep.subr.bf16.mxu1 %v1188_v0 }
 0x179   :  { %970 = vmatpush3.bf16.msra.mxu1 %v969_v33 }
 0x17a   :  { %971 = vmatprep.subr.bf16.mxu1 %v1188_v0 }
 0x17d   :  { %973 = vmatpush3.bf16.msra.mxu1 %v972_v36 }
 0x17e   :  { %974 = vmatprep.subr.bf16.mxu1 %v1188_v0 }
 0x181   :  { %976 = vmatpush3.bf16.msra.mxu1 %v975_v39 }
 0x182   :  { %977 = vmatprep.subr.bf16.mxu1 %v1188_v0 }
 0x185   :  { %979 = vmatpush3.bf16.msra.mxu1 %v978_v48 }
 0x23b   :  { %v305_v41 = vpop.f32.mrb[0].mxu1 }
 0x23c   :  { %v306_v42 = vadd.f32 %v620_v40, %v305_v41  ;;  %v778_v43 = vpop.f32.mrb[1].mxu1 }
 0x23e   :  { %vm309_vm2 = vcmp.gt.f32.partialorder %v306_v42, 0.0  ;;  %v310_v44 = vmul.f32 0.4, %v306_v42 }
 0x240   :  { %v311_v45 = vsel %vm309_vm2, %v306_v42, %v310_v44 }
 0x241   :  { %812 = vmatmul.mubr.f32.vlgmr.msra.gmra.mrb[2].mxu0 %v311_v45 }
 0x242   :  { %881 = vmatprep.mubr.msk.f32.mxu0 %vm1189_vm0, %v1190_v1  ;;  %982 = vmatpush3.bf16.msra.mxu0 %v981_v52  ;;  %v510_v1 = vld [vmem:[#allocation11 + $0x30] sm:$0xff] }
 0x243   :  { %983 = vmatprep.subr.bf16.mxu0 %v1188_v0  ;;  %v990_v59 = vpack.c.bf16 %v511_v58, %v510_v1 }
 0x246   :  { %985 = vmatpush3.bf16.msra.mxu0 %v984_v54 }
 0x247   :  { %986 = vmatprep.subr.bf16.mxu0 %v1188_v0 }
 0x24a   :  { %988 = vmatpush3.bf16.msra.mxu0 %v987_v57 }
 0x24b   :  { %989 = vmatprep.subr.bf16.mxu0 %v1188_v0 }
 0x24e   :  { %991 = vmatpush3.bf16.msra.mxu0 %v990_v59 }
 0x24f   :  { %992 = vmatprep.subr.bf16.mxu0 %v1188_v0 }
 0x252   :  { %994 = vmatpush3.bf16.msra.mxu0 %v993_v62 }
 0x253   :  { %995 = vmatprep.subr.bf16.mxu0 %v1188_v0 }
 0x256   :  { %997 = vmatpush3.bf16.msra.mxu0 %v996_v3 }
 0x257   :  { %998 = vmatprep.subr.bf16.mxu0 %v1188_v0 }
 0x25a   :  { %1000 = vmatpush3.bf16.msra.mxu0 %v999_v6 }
 0x25b   :  { %1001 = vmatprep.subr.bf16.mxu0 %v1188_v0 }
 0x25e   :  { %1003 = vmatpush3.bf16.msra.mxu0 %v1002_v15 }
 0x314   :  { %v401_v8 = vpop.f32.mrb[2].mxu0 }
 0x315   :  { %v402_v9 = vadd.f32 %v621_v7, %v401_v8  ;;  %v813_v10 = vpop.f32.mrb[3].mxu0 }
 0x317   :  { %vm405_vm3 = vcmp.gt.f32.partialorder %v402_v9, 0.0  ;;  %v406_v11 = vmul.f32 0.4, %v402_v9 }
 0x319   :  { %v407_v12 = vsel %vm405_vm3, %v402_v9, %v406_v11 }
 0x31a   :  { %847 = vmatmul.mubr.f32.vlgmr.msra.gmra.mrb[2].mxu1 %v407_v12 }
 0x3ed   :  { %v497_v0 = vpop.f32.mrb[2].mxu1 }
 0x3ee   :  { %v498_v17 = vadd.f32 %v622_v16, %v497_v0  ;;  %v848_v18 = vpop.f32.mrb[3].mxu1 }
 0x3f0   :  { %vm501_vm4 = vcmp.gt.f32.partialorder %v498_v17, 0.0  ;;  %v502_v19 = vmul.f32 0.4, %v498_v17 }
 0x3f2   :  { %v503_v20 = vsel %vm501_vm4, %v498_v17, %v502_v19 }
 0x3f3   :  { %882 = vmatmul.mubr.f32.vlgmr.msra.gmra.mrb[4].mxu0 %v503_v20 }
 0x4c6   :  { %v593_v22 = vpop.f32.mrb[4].mxu0 }
 0x4c7   :  { %v594_v23 = vadd.f32 %v623_v21, %v593_v22  ;;  %v883_v24 = vpop.f32.mrb[5].mxu0 }
 0x4c9   :  { %v598_v25 = vmul.f32 0.4, %v594_v23  ;;  %vm597_vm5 = vcmp.gt.f32.partialorder %v594_v23, 0.0 }
 0x4cb   :  { %v599_v26 = vsel %vm597_vm5, %v594_v23, %v598_v25 }
 0x4cc   :  { %600 = vst [vmem:[#allocation13] sm:$0xff] %v599_v26 }
 0x4cd   :  { %1159 = shalt.err (!%p1156_p10)
}
 0x4ce   :  { %s1160_s10 = scalar_lea.hbm %s1427_s11, 128 }
 0x4cf   :  { %p1161_p11 = scmp.ne.s32.totalorder %s1427_s11, %s1160_s10  ;;  %p1164_p12 = scmp.lt.u32.totalorder %s1160_s10, %s1427_s11 }
 0x4d1   :  { %p1166_p13 = pnand %p1164_p12, %p1161_p11 }
 0x4d3   :  { %1169 = shalt.err (!%p1166_p13)
}
 0x4d4   :  { %610 = dma.vmem_to_hbm [thread:$0]  %s608_s13, 128, %s1427_s11, [#allocation4]  }
 0x4d5   :  { %1178 = dma.done.wait [#allocation4], 128  }
 0x4d6   :  { %1179 = vsyncadd [#allocation4], 4294967168 }
 0x4d7   :  { %614 = vsyncpa [#allocation3], 1 }
 0x4d8   :  { %615 = vsyncpa [#allocation6], 1 }
 0x4d9   :  { %616 = vsyncpa [#allocation9], 1 }
 0x4da   :  { %617 = vsyncpa [#allocation12], 1 }
 0x4db   :  { %618 = vsyncpa [#allocation4], 1 }

</bundles_post_ra>
